<compile_context>
chip_gen: v6e
topology: v6e:2x2x1
jax: 0.10.0
libtpu: 0.0.40
codegen_flags: <defaults>
</compile_context>

<pallas_src>
import jax
import jax.numpy as jnp
from jax.experimental import pallas as pl
from jax.experimental.pallas import tpu as pltpu


def _round_up(n, m):
    return ((n + m - 1) // m) * m


def _mlp_kernel(x_ref, w1_ref, b1_ref, w2_ref, b2_ref, o_ref):
    # fc1: (tb, 512) @ (512, 128) -> (tb, 128), f32 accumulate on MXU
    h = jnp.dot(x_ref[...], w1_ref[...], preferred_element_type=jnp.float32)
    h = jnp.maximum(h + b1_ref[...], 0.0)          # bias + ReLU
    # Dropout(0.5) is identity in eval/inference mode.
    # TODO(synk): training-mode dropout (pltpu.stateful_bernoulli + 1/(1-p) scale) not emitted.
    # fc2 (padded): (tb, 128) @ (128, 128) -> (tb, 128); lane-dense output block.
    y = jnp.dot(h.astype(w2_ref.dtype), w2_ref[...],
                preferred_element_type=jnp.float32)
    o_ref[...] = (y + b2_ref[...]).astype(o_ref.dtype)


def face_anti_spoofing_forward(x, w1, b1, w2, b2, *, tb=None,
                               compute_dtype=jnp.bfloat16):
    """x: (B, 512).  w1: (512,128), b1: (128,), w2: (128,2), b2: (2,).

    Returns (B, 2) float32 logits.
    """
    B, D_in = x.shape
    D_hid = w1.shape[1]
    D_out = w2.shape[1]
    D_out_pad = 128                       # lane-dense output width

    # Bounded batch tile: multiple of 8, capped at 1024 (tiny vs VMEM on all gens).
    if tb is None:
        tb = min(1024, _round_up(B, 8))
    tb = max(8, (tb // 8) * 8)
    B_pad = _round_up(B, tb)

    # Pad batch (zero rows) so the grid is exact; remainder sliced off below.
    if B_pad != B:
        x = jnp.pad(x, ((0, B_pad - B), (0, 0)))

    # bf16 inputs/weights, f32 biases (added to the f32 accumulator).
    x_c = x.astype(compute_dtype)
    w1_c = w1.astype(compute_dtype)
    w2_p = jnp.zeros((D_hid, D_out_pad), compute_dtype).at[:, :D_out].set(
        w2.astype(compute_dtype))
    b1_2d = b1.reshape(1, D_hid).astype(jnp.float32)
    b2_p = jnp.zeros((1, D_out_pad), jnp.float32).at[:, :D_out].set(
        b2.astype(jnp.float32))

    grid = (B_pad // tb,)

    itemsize_c = jnp.dtype(compute_dtype).itemsize
    cost = pl.CostEstimate(
        flops=2 * B_pad * (D_in * D_hid + D_hid * D_out_pad),
        transcendentals=0,
        bytes_accessed=(B_pad * D_in * itemsize_c            # x read
                        + D_in * D_hid * itemsize_c          # W1
                        + D_hid * D_out_pad * itemsize_c     # W2 (padded)
                        + (D_hid + D_out_pad) * 4            # biases
                        + B_pad * D_out_pad * 4),            # output write
    )

    out = pl.pallas_call(
        _mlp_kernel,
        out_shape=jax.ShapeDtypeStruct((B_pad, D_out_pad), jnp.float32),
        grid_spec=pltpu.PrefetchScalarGridSpec(
            num_scalar_prefetch=0,
            grid=grid,
            in_specs=[
                pl.BlockSpec((tb, D_in), lambda i: (i, 0)),          # x tile
                pl.BlockSpec((D_in, D_hid), lambda i: (0, 0)),       # W1 (resident)
                pl.BlockSpec((1, D_hid), lambda i: (0, 0)),          # b1
                pl.BlockSpec((D_hid, D_out_pad), lambda i: (0, 0)),  # W2 padded
                pl.BlockSpec((1, D_out_pad), lambda i: (0, 0)),      # b2 padded
            ],
            out_specs=pl.BlockSpec((tb, D_out_pad), lambda i: (i, 0)),
        ),
        compiler_params=pltpu.CompilerParams(
            dimension_semantics=("parallel",),   # batch axis shards across TCs (v7x)
        ),
        cost_estimate=cost,
    )(x_c, w1_c, b1_2d, w2_p, b2_p)

    return out[:B, :D_out]


def init_params(key):
    """Deterministic init matching nn.Linear shapes (weights stored transposed)."""
    k1, k2, k3, k4 = jax.random.split(key, 4)
    lim1 = 1.0 / jnp.sqrt(512.0)
    lim2 = 1.0 / jnp.sqrt(128.0)
    w1 = jax.random.uniform(k1, (512, 128), jnp.float32, -lim1, lim1)
    b1 = jax.random.uniform(k2, (128,), jnp.float32, -lim1, lim1)
    w2 = jax.random.uniform(k3, (128, 2), jnp.float32, -lim2, lim2)
    b2 = jax.random.uniform(k4, (2,), jnp.float32, -lim2, lim2)
    return w1, b1, w2, b2


def reference_forward(x, w1, b1, w2, b2, compute_dtype=jnp.bfloat16):
    """Pure-JAX reference with the same bf16-input / f32-accumulate precision."""
    xc = x.astype(compute_dtype)
    h = jnp.dot(xc, w1.astype(compute_dtype),
                preferred_element_type=jnp.float32) + b1
    h = jnp.maximum(h, 0.0)
    y = jnp.dot(h.astype(compute_dtype), w2.astype(compute_dtype),
                preferred_element_type=jnp.float32) + b2
    return y


if __name__ == "__main__":
    key = jax.random.PRNGKey(0)
    kx, kp = jax.random.split(key)

    B = 8  # small batch for the smoke test (kernel is designed for large-batch inference)
    x = jax.random.normal(kx, (B, 512), jnp.float32)
    w1, b1, w2, b2 = init_params(kp)

    out = face_anti_spoofing_forward(x, w1, b1, w2, b2)
    out = jax.block_until_ready(out)

    ref = reference_forward(x, w1, b1, w2, b2)
    assert out.shape == (B, 2), out.shape
    assert jnp.allclose(out, ref, atol=1e-2, rtol=1e-2), "mismatch vs reference"

    print("KERNEL_OK")
</pallas_src>

<mosaic_0001>
module attributes {stable_mosaic.version = 11 : i64} {
  func.func @_mlp_kernel(%arg0: i32, %arg1: memref<8x512xbf16, #tpu.memory_space<vmem>>, %arg2: memref<512x128xbf16, #tpu.memory_space<vmem>>, %arg3: memref<1x128xf32, #tpu.memory_space<vmem>>, %arg4: memref<128x128xbf16, #tpu.memory_space<vmem>>, %arg5: memref<1x128xf32, #tpu.memory_space<vmem>>, %arg6: memref<8x128xf32, #tpu.memory_space<vmem>>) attributes {dimension_semantics = [#tpu.dimension_semantics<parallel>], iteration_bounds = array<i64: 1>, scalar_prefetch = 0 : i64, scratch_operands = 0 : i64, tpu.core_type = #tpu.core_type<tc>, window_params = [{transform_indices = @transform_0, window_bounds = array<i64: 8, 512>}, {pipeline_mode = #tpu.pipeline_mode<synchronous>, transform_indices = @transform_1, window_bounds = array<i64: 512, 128>}, {pipeline_mode = #tpu.pipeline_mode<synchronous>, transform_indices = @transform_2, window_bounds = array<i64: 1, 128>}, {pipeline_mode = #tpu.pipeline_mode<synchronous>, transform_indices = @transform_3, window_bounds = array<i64: 128, 128>}, {pipeline_mode = #tpu.pipeline_mode<synchronous>, transform_indices = @transform_4, window_bounds = array<i64: 1, 128>}, {transform_indices = @transform_5, window_bounds = array<i64: 8, 128>}]} {
    %c0 = arith.constant 0 : index
    %c0_0 = arith.constant 0 : index
    %0 = vector.load %arg1[%c0, %c0_0] : memref<8x512xbf16, #tpu.memory_space<vmem>>, vector<8x512xbf16>
    %c0_1 = arith.constant 0 : index
    %c0_2 = arith.constant 0 : index
    %1 = vector.load %arg2[%c0_1, %c0_2] : memref<512x128xbf16, #tpu.memory_space<vmem>>, vector<512x128xbf16>
    %cst = arith.constant dense<0.000000e+00> : vector<8x128xf32>
    %2 = tpu.matmul %0, %1, %cst {dimension_numbers = #tpu.dot_dimension_numbers<[1], [0], [0], [1], [0, 0, 1, 1], [], []>} : vector<8x512xbf16>, vector<512x128xbf16>, vector<8x128xf32> -> vector<8x128xf32>
    %c0_3 = arith.constant 0 : index
    %c0_4 = arith.constant 0 : index
    %3 = vector.load %arg3[%c0_3, %c0_4] : memref<1x128xf32, #tpu.memory_space<vmem>>, vector<1x128xf32>
    %4 = vector.broadcast %3 : vector<1x128xf32> to vector<8x128xf32>
    %5 = arith.addf %2, %4 : vector<8x128xf32>
    %cst_5 = arith.constant 0.000000e+00 : f32
    %6 = vector.broadcast %cst_5 : f32 to vector<8x128xf32>
    %7 = arith.maximumf %5, %6 : vector<8x128xf32>
    %8 = arith.truncf %7 : vector<8x128xf32> to vector<8x128xbf16>
    %c0_6 = arith.constant 0 : index
    %c0_7 = arith.constant 0 : index
    %9 = vector.load %arg4[%c0_6, %c0_7] : memref<128x128xbf16, #tpu.memory_space<vmem>>, vector<128x128xbf16>
    %cst_8 = arith.constant dense<0.000000e+00> : vector<8x128xf32>
    %10 = tpu.matmul %8, %9, %cst_8 {dimension_numbers = #tpu.dot_dimension_numbers<[1], [0], [0], [1], [0, 0, 1, 1], [], []>} : vector<8x128xbf16>, vector<128x128xbf16>, vector<8x128xf32> -> vector<8x128xf32>
    %c0_9 = arith.constant 0 : index
    %c0_10 = arith.constant 0 : index
    %11 = vector.load %arg5[%c0_9, %c0_10] : memref<1x128xf32, #tpu.memory_space<vmem>>, vector<1x128xf32>
    %12 = vector.broadcast %11 : vector<1x128xf32> to vector<8x128xf32>
    %13 = arith.addf %10, %12 : vector<8x128xf32>
    %c0_11 = arith.constant 0 : index
    %c0_12 = arith.constant 0 : index
    %14 = vector.load %arg6[%c0_11, %c0_12] : memref<8x128xf32, #tpu.memory_space<vmem>>, vector<8x128xf32>
    tpu.vector_store %arg6[%c0_11, %c0_12], %13 {strides = array<i32>} : memref<8x128xf32, #tpu.memory_space<vmem>>, vector<8x128xf32>,
    return
  }
  func.func @transform_0(%arg0: i32) -> (i32, i32) {
    %c0_i32 = arith.constant 0 : i32
    %c0_i32_0 = arith.constant 0 : i32
    return %arg0, %c0_i32 : i32, i32
  }
  func.func @transform_1(%arg0: i32) -> (i32, i32) {
    %c0_i32 = arith.constant 0 : i32
    %c0_i32_0 = arith.constant 0 : i32
    %c0_i32_1 = arith.constant 0 : i32
    return %c0_i32, %c0_i32_0 : i32, i32
  }
  func.func @transform_2(%arg0: i32) -> (i32, i32) {
    %c0_i32 = arith.constant 0 : i32
    %c0_i32_0 = arith.constant 0 : i32
    %c0_i32_1 = arith.constant 0 : i32
    return %c0_i32, %c0_i32_0 : i32, i32
  }
  func.func @transform_3(%arg0: i32) -> (i32, i32) {
    %c0_i32 = arith.constant 0 : i32
    %c0_i32_0 = arith.constant 0 : i32
    %c0_i32_1 = arith.constant 0 : i32
    return %c0_i32, %c0_i32_0 : i32, i32
  }
  func.func @transform_4(%arg0: i32) -> (i32, i32) {
    %c0_i32 = arith.constant 0 : i32
    %c0_i32_0 = arith.constant 0 : i32
    %c0_i32_1 = arith.constant 0 : i32
    return %c0_i32, %c0_i32_0 : i32, i32
  }
  func.func @transform_5(%arg0: i32) -> (i32, i32) {
    %c0_i32 = arith.constant 0 : i32
    %c0_i32_0 = arith.constant 0 : i32
    return %arg0, %c0_i32 : i32, i32
  }
}

</mosaic_0001>

<bundles_post_ra>
// kernel: tpu_custom_call.1
= control target key start
LH: loop header
LB: loop body
LE: loop exit
PB: predicated region body
PF: predicated region fallthrough
CT: control target
= control target key end

     0   :  { %10 = vsyncpa [#allocation3], 0  ;;  %s863_s0 = inlined_call_operand.hbm [shape: bf16[8,512], index: 0, kind: input, shape index: {}]   ;;  %s864_s1 = inlined_call_operand.hbm [shape: bf16[512,128], index: 1, kind: input, shape index: {}]   ;;  %s865_s2 = inlined_call_operand.vmem [shape: f32[1,128], index: 2, kind: input, shape index: {}]   ;;  %s866_s3 = inlined_call_operand.hbm [shape: bf16[128,128], index: 3, kind: input, shape index: {}]   ;;  %s867_s4 = inlined_call_operand.vmem [shape: f32[1,128], index: 4, kind: input, shape index: {}]   ;;  %s868_s5 = inlined_call_operand.hbm [shape: f32[8,128], index: 5, kind: output, shape index: {}]  }
   0x1   :  { %11 = vsyncpa [#allocation6], 0 }
   0x2   :  { %12 = vsyncpa [#allocation4], 0  ;;  %s807_s18 = smov [#allocation5]  }
   0x3   :  { %s28_s19 = sshll.u32 %s807_s18, 4  ;;  %s29_s19 = int_to_ptr.vmem [resolvable:$true] %s28_s19 }
   0x4   :  { %s729_s20 = scalar_lea.vmem %s29_s19, 4096  ;;  %p734_p1 = scmp.lt.s32.totalorder %s29_s19, %s29_s19 }
   0x5   :  { %p730_p0 = scmp.ne.s32.totalorder %s29_s19, %s729_s20  ;;  %p735_p2 = scmp.lt.s32.totalorder %s729_s20, %s729_s20 }
   0x7   :  { %p736_p3 = por %p735_p2, %p734_p1 }
   0x9   :  { %p737_p4 = pnand %p736_p3, %p730_p0 }
   0xb   :  { %740 = shalt.err (!%p737_p4)
}
   0xc   :  { %s808_s21 = smov 64   ;;  %s809_s22 = smov 4  }
   0xd   :  { %34 = dma.hbm_to_vmem [thread:$0]  %s864_s1, 4096, %s29_s19, [#allocation6], %s808_s21, %s808_s21, %s809_s22  }
   0xe   :  { %s810_s25 = smov [#allocation2]   ;;  %s811_s27 = smov [#allocation7]  }
   0xf   :  { %s19_s26 = sshll.u32 %s810_s25, 4  ;;  %s42_s28 = sshll.u32 %s811_s27, 4  ;;  %s20_s26 = int_to_ptr.vmem [resolvable:$true] %s19_s26  ;;  %s43_s28 = int_to_ptr.vmem [resolvable:$true] %s42_s28 }
  0x10   :  { %s749_s29 = scalar_lea.vmem %s20_s26, 256  ;;  %p754_p6 = scmp.lt.s32.totalorder %s20_s26, %s20_s26 }
  0x11   :  { %p750_p5 = scmp.ne.s32.totalorder %s20_s26, %s749_s29  ;;  %p755_p7 = scmp.lt.s32.totalorder %s749_s29, %s749_s29 }
  0x13   :  { %p756_p8 = por %p755_p7, %p754_p6 }
  0x15   :  { %p757_p9 = pnand %p756_p8, %p750_p5 }
  0x17   :  { %760 = shalt.err (!%p757_p9)
}
  0x18   :  { %22 = dma.hbm_to_vmem [thread:$0]  %s863_s0, 256, %s20_s26, [#allocation3]  }
  0x19   :  { %s769_s7 = scalar_lea.vmem %s43_s28, 1024  ;;  %p774_p11 = scmp.lt.s32.totalorder %s43_s28, %s43_s28 }
  0x1a   :  { %p770_p10 = scmp.ne.s32.totalorder %s43_s28, %s769_s7  ;;  %p775_p12 = scmp.lt.s32.totalorder %s769_s7, %s769_s7 }
  0x1c   :  { %p776_p13 = por %p775_p12, %p774_p11 }
  0x1e   :  { %p777_p0 = pnand %p776_p13, %p770_p10 }
  0x20   :  { %780 = shalt.err (!%p777_p0)
}
  0x21   :  { %48 = dma.hbm_to_vmem [thread:$0]  %s866_s3, 1024, %s43_s28, [#allocation6], %s808_s21, %s808_s21, %s809_s22  }
  0x22   :  { %801 = dma.done.wait [#allocation3], 256  }
  0x23   :  { %802 = vsyncadd [#allocation3], 4294967040 }
  0x24   :  { %803 = dma.done.wait [#allocation6], 5120  }
  0x25   :  { %804 = vsyncadd [#allocation6], 4294962176  ;;  %v677_v0 = vld [vmem:[#allocation5 + $0x78] sm:$0xff]   ;;  %v681_v4 = vld [vmem:[#allocation5 + $0x70] sm:$0xff]   ;;  %v812_v39 = vmov 0.0   ;;  %vm813_vm0 = vmmov 0  }
  0x26   :  { %v678_v1 = vld [vmem:[#allocation5 + $0xf8] sm:$0xff]   ;;  %596 = vmatprep.subr.bf16.mxu0 %v677_v0  ;;  %v682_v5 = vld [vmem:[#allocation5 + $0xf0] sm:$0xff]   ;;  %v685_v8 = vld [vmem:[#allocation5 + $0x68] sm:$0xff]   ;;  %s814_s11 = smov [#allocation8]  }
  0x27   :  { %v679_v2 = vld [vmem:[#allocation5 + $0x38] sm:$0xff]   ;;  %618 = vmatprep.subr.bf16.mxu1 %v678_v1  ;;  %v683_v6 = vld [vmem:[#allocation5 + $0x30] sm:$0xff]   ;;  %v686_v9 = vld [vmem:[#allocation5 + $0xe8] sm:$0xff]   ;;  %s540_s12 = sshll.u32 %s814_s11, 4  ;;  %s541_s12 = int_to_ptr.vmem [resolvable:$true] %s540_s12 }
  0x28   :  { %v680_v3 = vld [vmem:[#allocation5 + $0xb8] sm:$0xff]   ;;  %597 = vmatpush3.bf16.msra.mxu0 %v679_v2  ;;  %v684_v7 = vld [vmem:[#allocation5 + $0xb0] sm:$0xff]   ;;  %v687_v10 = vld [vmem:[#allocation5 + $0x28] sm:$0xff]   ;;  %p786_p2 = scmp.lt.s32.totalorder %s541_s12, %s541_s12 }
  0x29   :  { %619 = vmatpush3.bf16.msra.mxu1 %v680_v3  ;;  %598 = vmatprep.subr.bf16.mxu0 %v681_v4  ;;  %v688_v11 = vld [vmem:[#allocation5 + $0xa8] sm:$0xff]   ;;  %v689_v12 = vld [vmem:[#allocation5 + $0x60] sm:$0xff]   ;;  %v693_v16 = vld [vmem:[#allocation5 + $0x58] sm:$0xff]  }
  0x2a   :  { %620 = vmatprep.subr.bf16.mxu1 %v682_v5  ;;  %v690_v13 = vld [vmem:[#allocation5 + $0xe0] sm:$0xff]   ;;  %v694_v17 = vld [vmem:[#allocation5 + $0xd8] sm:$0xff]   ;;  %v697_v20 = vld [vmem:[#allocation5 + $0x50] sm:$0xff]  }
  0x2b   :  { %v691_v14 = vld [vmem:[#allocation5 + $0x20] sm:$0xff]   ;;  %v695_v18 = vld [vmem:[#allocation5 + $0x18] sm:$0xff]   ;;  %v698_v21 = vld [vmem:[#allocation5 + $0xd0] sm:$0xff]  }
  0x2c   :  { %599 = vmatpush3.bf16.msra.mxu0 %v683_v6  ;;  %v692_v15 = vld [vmem:[#allocation5 + $0xa0] sm:$0xff]   ;;  %v696_v19 = vld [vmem:[#allocation5 + $0x98] sm:$0xff]   ;;  %v699_v22 = vld [vmem:[#allocation5 + $0x10] sm:$0xff]  }
  0x2d   :  { %621 = vmatpush3.bf16.msra.mxu1 %v684_v7  ;;  %600 = vmatprep.subr.bf16.mxu0 %v685_v8  ;;  %v700_v23 = vld [vmem:[#allocation5 + $0x90] sm:$0xff]   ;;  %v701_v24 = vld [vmem:[#allocation5 + $0x48] sm:$0xff]   ;;  %v705_v28 = vld [vmem:[#allocation5 + $0x40] sm:$0xff]  }
  0x2e   :  { %622 = vmatprep.subr.bf16.mxu1 %v686_v9  ;;  %v702_v25 = vld [vmem:[#allocation5 + $0xc8] sm:$0xff]   ;;  %v706_v29 = vld [vmem:[#allocation5 + $0xc0] sm:$0xff]   ;;  %v61_v32 = vld [vmem:[#allocation2] sm:$0xff] }
  0x2f   :  { %v703_v26 = vld [vmem:[#allocation5 + $0x8] sm:$0xff]   ;;  %v707_v30 = vld [vmem:[#allocation5] sm:$0xff]   ;;  %v62_v33 = vld [vmem:[#allocation2 + $0x8] sm:$0xff]  ;;  %v551_v34 = vcombine.low %v61_v32, %v61_v32  ;;  %v552_v35 = vcombine.high %v61_v32, %v61_v32 }
  0x30   :  { %601 = vmatpush3.bf16.msra.mxu0 %v687_v10  ;;  %v704_v27 = vld [vmem:[#allocation5 + $0x88] sm:$0xff]   ;;  %v708_v31 = vld [vmem:[#allocation5 + $0x80] sm:$0xff]   ;;  %v553_v36 = vcombine.low %v62_v33, %v62_v33  ;;  %v554_v37 = vcombine.high %v62_v33, %v62_v33  ;;  %v713_v38 = vld [vmem:[#allocation7 + $0x38] sm:$0xff]  }
  0x31   :  { %623 = vmatpush3.bf16.msra.mxu1 %v688_v11  ;;  %602 = vmatprep.subr.bf16.mxu0 %v689_v12  ;;  %v714_v40 = vld [vmem:[#allocation7 + $0x30] sm:$0xff]   ;;  %v715_v41 = vld [vmem:[#allocation7 + $0x28] sm:$0xff]   ;;  %v716_v42 = vld [vmem:[#allocation7 + $0x20] sm:$0xff]  }
  0x32   :  { %624 = vmatprep.subr.bf16.mxu1 %v690_v13  ;;  %372 = vmatprep.mubr.bf16.mxu0 %v552_v35  ;;  %v717_v43 = vld [vmem:[#allocation7 + $0x18] sm:$0xff]   ;;  %v718_v44 = vld [vmem:[#allocation7 + $0x10] sm:$0xff]   ;;  %v719_v45 = vld [vmem:[#allocation7 + $0x8] sm:$0xff]  }
  0x33   :  { %412 = vmatprep.mubr.bf16.mxu1 %v554_v37  ;;  %v720_v46 = vld [vmem:[#allocation7] sm:$0xff]   ;;  %v550_v49 = vld [vmem:[%s865_s2] ss:$0 sm:$0xff]  ;;  %s781_s2 = scalar_lea.vmem %s541_s12, 128 }
  0x34   :  { %603 = vmatpush3.bf16.msra.mxu0 %v691_v14  ;;  %v587_v62 = vld [vmem:[%s867_s4] ss:$0 sm:$0xff]  ;;  %p782_p1 = scmp.ne.s32.totalorder %s541_s12, %s781_s2  ;;  %p787_p3 = scmp.lt.s32.totalorder %s781_s2, %s781_s2 }
  0x35   :  { %625 = vmatpush3.bf16.msra.mxu1 %v692_v15  ;;  %604 = vmatprep.subr.bf16.mxu0 %v693_v16 }
  0x36   :  { %626 = vmatprep.subr.bf16.mxu1 %v694_v17  ;;  %p788_p4 = por %p787_p3, %p786_p2 }
  0x38   :  { %605 = vmatpush3.bf16.msra.mxu0 %v695_v18  ;;  %p789_p5 = pnand %p788_p4, %p782_p1 }
  0x39   :  { %627 = vmatpush3.bf16.msra.mxu1 %v696_v19  ;;  %606 = vmatprep.subr.bf16.mxu0 %v697_v20 }
  0x3a   :  { %628 = vmatprep.subr.bf16.mxu1 %v698_v21 }
  0x3c   :  { %607 = vmatpush3.bf16.msra.mxu0 %v699_v22 }
  0x3d   :  { %629 = vmatpush3.bf16.msra.mxu1 %v700_v23  ;;  %608 = vmatprep.subr.bf16.mxu0 %v701_v24 }
  0x3e   :  { %630 = vmatprep.subr.bf16.mxu1 %v702_v25 }
  0x40   :  { %609 = vmatpush3.bf16.msra.mxu0 %v703_v26 }
  0x41   :  { %631 = vmatpush3.bf16.msra.mxu1 %v704_v27  ;;  %610 = vmatprep.subr.bf16.mxu0 %v705_v28 }
  0x42   :  { %632 = vmatprep.subr.bf16.mxu1 %v706_v29 }
  0x44   :  { %611 = vmatpush3.bf16.msra.mxu0 %v707_v30 }
  0x45   :  { %633 = vmatpush3.bf16.msra.mxu1 %v708_v31  ;;  %649 = vmatprep.subr.bf16.mxu0 %v812_v39 }
  0x47   :  { %373 = vmatmul.mubr.bf16.vlgmr.msra.gmra.mxu0 %v551_v34 }
  0x48   :  { %413 = vmatmul.mubr.bf16.vlgmr.msra.gmra.mxu1 %v553_v36  ;;  %650 = vmatpush3.bf16.msra.mxu0 %v713_v38 }
  0x49   :  { %651 = vmatprep.subr.bf16.mxu0 %v812_v39  ;;  %665 = vmatprep.mubr.msk.bf16.mxu0 %vm813_vm0, %v812_v39 }
  0x4c   :  { %652 = vmatpush3.bf16.msra.mxu0 %v714_v40 }
  0x4d   :  { %653 = vmatprep.subr.bf16.mxu0 %v812_v39 }
  0x50   :  { %654 = vmatpush3.bf16.msra.mxu0 %v715_v41 }
  0x51   :  { %655 = vmatprep.subr.bf16.mxu0 %v812_v39 }
  0x54   :  { %656 = vmatpush3.bf16.msra.mxu0 %v716_v42 }
  0x55   :  { %657 = vmatprep.subr.bf16.mxu0 %v812_v39 }
  0x58   :  { %658 = vmatpush3.bf16.msra.mxu0 %v717_v43 }
  0x59   :  { %659 = vmatprep.subr.bf16.mxu0 %v812_v39 }
  0x5c   :  { %660 = vmatpush3.bf16.msra.mxu0 %v718_v44 }
  0x5d   :  { %661 = vmatprep.subr.bf16.mxu0 %v812_v39 }
  0x60   :  { %662 = vmatpush3.bf16.msra.mxu0 %v719_v45 }
  0x61   :  { %663 = vmatprep.subr.bf16.mxu0 %v812_v39 }
  0x64   :  { %664 = vmatpush3.bf16.msra.mxu0 %v720_v46 }
 0x107   :  { %v612_v47 = vpop.f32.mrf.mxu0 }
 0x108   :  { %v634_v48 = vpop.f32.mrf.mxu1 }
 0x109   :  { %v613_v50 = vpop.f32.mrf.mxu0 }
 0x10a   :  { %v635_v51 = vpop.f32.mrf.mxu1  ;;  %v614_v52 = vadd.f32 %v613_v50, %v612_v47 }
 0x10b   :  { %v615_v53 = vpop.f32.mrf.mxu0  ;;  %v636_v56 = vadd.f32 %v635_v51, %v634_v48 }
 0x10c   :  { %v637_v54 = vpop.f32.mrf.mxu1  ;;  %v375_v55 = vadd.f32 %v614_v52, %v550_v49 }
 0x10d   :  { %v616_v57 = vpop.f32.mrf.mxu0 }
 0x10e   :  { %v638_v58 = vpop.f32.mrf.mxu1  ;;  %v415_v59 = vadd.f32 %v636_v56, %v375_v55 }
 0x110   :  { %v420_v60 = vmax.f32 %v415_v59, 0.0 }
 0x112   :  { %v421_v61 = vpack.c.bf16 %v420_v60, %v420_v60 }
 0x114   :  { %666 = vmatmul.mubr.bf16.vlgmr.msra.gmra.mxu0 %v421_v61 }
 0x1d4   :  { %v527_v63 = vpop.f32.mrf.mxu0 }
 0x1d5   :  { %v528_v0 = vadd.f32 %v587_v62, %v527_v63 }
 0x1d6   :  { %v667_v1 = vpop.f32.mrf.mxu0 }
 0x1d7   :  { %533 = vst [vmem:[#allocation8] sm:$0xff] %v528_v0 }
 0x1d8   :  { %v530_v2 = vpop.f32.mrf.mxu0 }
 0x1d9   :  { %792 = shalt.err (!%p789_p5)
}
 0x1da   :  { %543 = dma.vmem_to_hbm [thread:$0]  %s541_s12, 128, %s868_s5, [#allocation4]   ;;  %v668_v3 = vpop.f32.mrf.mxu0 }
 0x1db   :  { %805 = dma.done.wait [#allocation4], 128  }
 0x1dc   :  { %806 = vsyncadd [#allocation4], 4294967168 }
 0x1dd   :  { %547 = vsyncpa [#allocation3], 1 }
 0x1de   :  { %548 = vsyncpa [#allocation6], 1 }
 0x1df   :  { %549 = vsyncpa [#allocation4], 1 }

</bundles_post_ra>
